<compile_context>
chip_gen: v6e
topology: v6e:2x2x1
jax: 0.10.0
libtpu: 0.0.40
codegen_flags: <defaults>
</compile_context>

<pallas_src>
import jax
import jax.numpy as jnp
from jax.experimental import pallas as pl
from jax.experimental.pallas import tpu as pltpu

INPUT_SIZE = 7
HIDDEN_SIZE = 50
OUTPUT_SIZE = 2

# Rows of the batch processed per grid step for large batches (multiple of 256,
# sized well inside the 32 MiB scoped-VMEM default that holds on v5e/v6e/v7x).
DEFAULT_TILE_BATCH = 2048


def _round_up(n, m):
    return ((n + m - 1) // m) * m


def _sigmoid(x):
    # exp and the approximate reciprocal both issue on the EUP slot,
    # keeping VALU slots free for the fc1 broadcast-FMAs.
    return pl.reciprocal(1.0 + jnp.exp(-x), approx=True)


def mlp_kernel(x_ref, w1_ref, b1_ref, w2_ref, b2_ref, w3_ref, b3_ref, o_ref):
    x = x_ref[...]                       # (TB, 7)   f32
    w1 = w1_ref[...]                     # (7, 50)   f32

    # ---- fc1 as an unrolled 7-term VPU broadcast-FMA (K=7 would be >94%
    #      padding waste on the MXU) ----
    z1 = b1_ref[...] + x[:, 0:1] * w1[0:1, :]
    for k in range(1, INPUT_SIZE):
        z1 = z1 + x[:, k:k + 1] * w1[k:k + 1, :]
    h1 = _sigmoid(z1)                    # (TB, 50)  f32

    # ---- fc2 on the MXU: bf16 inputs, f32 accumulation ----
    z2 = jnp.dot(h1.astype(jnp.bfloat16), w2_ref[...],
                 preferred_element_type=jnp.float32) + b2_ref[...]
    h2 = _sigmoid(z2)                    # (TB, 50)  f32

    # ---- fc3 on the MXU: bf16 inputs, f32 accumulation ----
    logits = jnp.dot(h2.astype(jnp.bfloat16), w3_ref[...],
                     preferred_element_type=jnp.float32) + b3_ref[...]  # (TB, 2)

    # ---- 2-class log_softmax with elementwise ops (no lane-wide XLU reduce) ----
    l0 = logits[:, 0:1]
    l1 = logits[:, 1:2]
    m = jnp.maximum(l0, l1)
    lse = m + jnp.log(jnp.exp(l0 - m) + jnp.exp(l1 - m))   # (TB, 1)
    o_ref[...] = logits - lse


def net_forward(x, params, *, tile_batch=DEFAULT_TILE_BATCH):
    """x: (B, 7) float32; params: dict of weights/biases. Returns (B, 2) log-probs."""
    w1, b1 = params["w1"], params["b1"]
    w2, b2 = params["w2"].astype(jnp.bfloat16), params["b2"]
    w3, b3 = params["w3"].astype(jnp.bfloat16), params["b3"]

    B = x.shape[0]
    tb = min(tile_batch, _round_up(B, 8))     # sublane-aligned batch tile
    num_tiles = pl.cdiv(B, tb)

    def const_spec(shape):
        # Weight/bias blocks: same block every grid step -> fetched once,
        # stays resident in VMEM.
        return pl.BlockSpec(shape, lambda i: (0, 0))

    flops_per_row = 2 * (INPUT_SIZE * HIDDEN_SIZE
                         + HIDDEN_SIZE * HIDDEN_SIZE
                         + HIDDEN_SIZE * OUTPUT_SIZE)
    trans_per_row = 4 * HIDDEN_SIZE + 3       # 2 sigmoids (exp+recip) + log_softmax
    weight_bytes = ((INPUT_SIZE * HIDDEN_SIZE + HIDDEN_SIZE) * 4
                    + (HIDDEN_SIZE * HIDDEN_SIZE + HIDDEN_SIZE) * 2
                    + (HIDDEN_SIZE * OUTPUT_SIZE + OUTPUT_SIZE) * 2)
    cost = pl.CostEstimate(
        flops=int(B * flops_per_row),
        transcendentals=int(B * trans_per_row),
        bytes_accessed=int(B * 4 * (INPUT_SIZE + OUTPUT_SIZE) + weight_bytes),
    )

    return pl.pallas_call(
        mlp_kernel,
        out_shape=jax.ShapeDtypeStruct((B, OUTPUT_SIZE), jnp.float32),
        grid=(num_tiles,),
        in_specs=[
            pl.BlockSpec((tb, INPUT_SIZE), lambda i: (i, 0)),   # x: batch-tiled
            const_spec((INPUT_SIZE, HIDDEN_SIZE)),              # w1
            const_spec((1, HIDDEN_SIZE)),                       # b1
            const_spec((HIDDEN_SIZE, HIDDEN_SIZE)),             # w2 (bf16)
            const_spec((1, HIDDEN_SIZE)),                       # b2
            const_spec((HIDDEN_SIZE, OUTPUT_SIZE)),             # w3 (bf16)
            const_spec((1, OUTPUT_SIZE)),                       # b3
        ],
        out_specs=pl.BlockSpec((tb, OUTPUT_SIZE), lambda i: (i, 0)),
        compiler_params=pltpu.CompilerParams(
            dimension_semantics=("parallel",),        # megacore sharding on v7x
            vmem_limit_bytes=32 * 1024 * 1024,        # safe on v5e/v6e/v7x
        ),
        cost_estimate=cost,
    )(x, w1, b1, w2, b2, w3, b3)


def init_params(key):
    """Deterministic init mimicking PyTorch nn.Linear default
    (U[-1/sqrt(fan_in), 1/sqrt(fan_in)]). Weights stored as (in, out)."""
    def linear(k, fan_in, fan_out):
        kw, kb = jax.random.split(k)
        bound = 1.0 / jnp.sqrt(fan_in)
        w = jax.random.uniform(kw, (fan_in, fan_out), jnp.float32, -bound, bound)
        b = jax.random.uniform(kb, (1, fan_out), jnp.float32, -bound, bound)
        return w, b

    k1, k2, k3 = jax.random.split(key, 3)
    w1, b1 = linear(k1, INPUT_SIZE, HIDDEN_SIZE)
    w2, b2 = linear(k2, HIDDEN_SIZE, HIDDEN_SIZE)
    w3, b3 = linear(k3, HIDDEN_SIZE, OUTPUT_SIZE)
    return {"w1": w1, "b1": b1, "w2": w2, "b2": b2, "w3": w3, "b3": b3}


def reference_forward_f32(x, params):
    """Pure-JAX f32 reference (matches the PyTorch module semantics)."""
    h1 = jax.nn.sigmoid(x @ params["w1"] + params["b1"])
    h2 = jax.nn.sigmoid(h1 @ params["w2"] + params["b2"])
    logits = h2 @ params["w3"] + params["b3"]
    return jax.nn.log_softmax(logits, axis=-1)


def reference_forward_bf16(x, params):
    """Reference matching the kernel's bf16 matmul inputs / f32 accumulation."""
    h1 = jax.nn.sigmoid(x @ params["w1"] + params["b1"])
    z2 = jnp.dot(h1.astype(jnp.bfloat16), params["w2"].astype(jnp.bfloat16),
                 preferred_element_type=jnp.float32) + params["b2"]
    h2 = jax.nn.sigmoid(z2)
    logits = jnp.dot(h2.astype(jnp.bfloat16), params["w3"].astype(jnp.bfloat16),
                     preferred_element_type=jnp.float32) + params["b3"]
    return jax.nn.log_softmax(logits, axis=-1)


if __name__ == "__main__":
    key = jax.random.PRNGKey(0)
    k_params, k_x = jax.random.split(key)

    params = init_params(k_params)
    batch = 64
    x = jax.random.normal(k_x, (batch, INPUT_SIZE), dtype=jnp.float32)

    # Small tile so the test exercises multiple pipelined grid steps (4 here).
    out = net_forward(x, params, tile_batch=16)
    out = jax.block_until_ready(out)

    assert out.shape == (batch, OUTPUT_SIZE)
    assert bool(jnp.all(jnp.isfinite(out)))
    # log_softmax invariant: rows of exp(out) sum to 1.
    assert jnp.allclose(jnp.exp(out).sum(axis=-1), 1.0, atol=1e-4)
    # Tight check vs a reference with matching bf16 matmul inputs.
    ref_bf16 = reference_forward_bf16(x, params)
    assert jnp.allclose(out, ref_bf16, atol=3e-2, rtol=0), "mismatch vs bf16 reference"
    # Loose check vs the pure-f32 (PyTorch-equivalent) reference.
    ref_f32 = reference_forward_f32(x, params)
    assert jnp.allclose(out, ref_f32, atol=1e-1, rtol=0), "mismatch vs f32 reference"

    print("KERNEL_OK")
</pallas_src>

<mosaic_0001>
module attributes {stable_mosaic.version = 11 : i64} {
  func.func @mlp_kernel(%arg0: i32, %arg1: memref<16x7xf32, #tpu.memory_space<vmem>>, %arg2: memref<7x50xf32, #tpu.memory_space<vmem>>, %arg3: memref<1x50xf32, #tpu.memory_space<vmem>>, %arg4: memref<50x50xbf16, #tpu.memory_space<vmem>>, %arg5: memref<1x50xf32, #tpu.memory_space<vmem>>, %arg6: memref<50x2xbf16, #tpu.memory_space<vmem>>, %arg7: memref<1x2xf32, #tpu.memory_space<vmem>>, %arg8: memref<16x2xf32, #tpu.memory_space<vmem>>) attributes {dimension_semantics = [#tpu.dimension_semantics<parallel>], iteration_bounds = array<i64: 4>, scalar_prefetch = 0 : i64, scratch_operands = 0 : i64, tpu.core_type = #tpu.core_type<tc>, window_params = [{transform_indices = @transform_0, window_bounds = array<i64: 16, 7>}, {pipeline_mode = #tpu.pipeline_mode<synchronous>, transform_indices = @transform_1, window_bounds = array<i64: 7, 50>}, {pipeline_mode = #tpu.pipeline_mode<synchronous>, transform_indices = @transform_2, window_bounds = array<i64: 1, 50>}, {pipeline_mode = #tpu.pipeline_mode<synchronous>, transform_indices = @transform_3, window_bounds = array<i64: 50, 50>}, {pipeline_mode = #tpu.pipeline_mode<synchronous>, transform_indices = @transform_4, window_bounds = array<i64: 1, 50>}, {pipeline_mode = #tpu.pipeline_mode<synchronous>, transform_indices = @transform_5, window_bounds = array<i64: 50, 2>}, {pipeline_mode = #tpu.pipeline_mode<synchronous>, transform_indices = @transform_6, window_bounds = array<i64: 1, 2>}, {transform_indices = @transform_7, window_bounds = array<i64: 16, 2>}]} {
    %c0 = arith.constant 0 : index
    %c0_0 = arith.constant 0 : index
    %0 = vector.load %arg1[%c0, %c0_0] : memref<16x7xf32, #tpu.memory_space<vmem>>, vector<16x7xf32>
    %c0_1 = arith.constant 0 : index
    %c0_2 = arith.constant 0 : index
    %1 = vector.load %arg2[%c0_1, %c0_2] : memref<7x50xf32, #tpu.memory_space<vmem>>, vector<7x50xf32>
    %c0_3 = arith.constant 0 : index
    %c0_4 = arith.constant 0 : index
    %2 = vector.load %arg3[%c0_3, %c0_4] : memref<1x50xf32, #tpu.memory_space<vmem>>, vector<1x50xf32>
    %3 = vector.extract_strided_slice %0 {offsets = [0, 0], sizes = [16, 1], strides = [1, 1]} : vector<16x7xf32> to vector<16x1xf32>
    %4 = vector.extract_strided_slice %1 {offsets = [0, 0], sizes = [1, 50], strides = [1, 1]} : vector<7x50xf32> to vector<1x50xf32>
    %5 = vector.broadcast %3 : vector<16x1xf32> to vector<16x50xf32>
    %6 = vector.broadcast %4 : vector<1x50xf32> to vector<16x50xf32>
    %7 = arith.mulf %5, %6 : vector<16x50xf32>
    %8 = vector.broadcast %2 : vector<1x50xf32> to vector<16x50xf32>
    %9 = arith.addf %8, %7 : vector<16x50xf32>
    %10 = vector.extract_strided_slice %0 {offsets = [0, 1], sizes = [16, 1], strides = [1, 1]} : vector<16x7xf32> to vector<16x1xf32>
    %11 = vector.extract_strided_slice %1 {offsets = [1, 0], sizes = [1, 50], strides = [1, 1]} : vector<7x50xf32> to vector<1x50xf32>
    %12 = vector.broadcast %10 : vector<16x1xf32> to vector<16x50xf32>
    %13 = vector.broadcast %11 : vector<1x50xf32> to vector<16x50xf32>
    %14 = arith.mulf %12, %13 : vector<16x50xf32>
    %15 = arith.addf %9, %14 : vector<16x50xf32>
    %16 = vector.extract_strided_slice %0 {offsets = [0, 2], sizes = [16, 1], strides = [1, 1]} : vector<16x7xf32> to vector<16x1xf32>
    %17 = vector.extract_strided_slice %1 {offsets = [2, 0], sizes = [1, 50], strides = [1, 1]} : vector<7x50xf32> to vector<1x50xf32>
    %18 = vector.broadcast %16 : vector<16x1xf32> to vector<16x50xf32>
    %19 = vector.broadcast %17 : vector<1x50xf32> to vector<16x50xf32>
    %20 = arith.mulf %18, %19 : vector<16x50xf32>
    %21 = arith.addf %15, %20 : vector<16x50xf32>
    %22 = vector.extract_strided_slice %0 {offsets = [0, 3], sizes = [16, 1], strides = [1, 1]} : vector<16x7xf32> to vector<16x1xf32>
    %23 = vector.extract_strided_slice %1 {offsets = [3, 0], sizes = [1, 50], strides = [1, 1]} : vector<7x50xf32> to vector<1x50xf32>
    %24 = vector.broadcast %22 : vector<16x1xf32> to vector<16x50xf32>
    %25 = vector.broadcast %23 : vector<1x50xf32> to vector<16x50xf32>
    %26 = arith.mulf %24, %25 : vector<16x50xf32>
    %27 = arith.addf %21, %26 : vector<16x50xf32>
    %28 = vector.extract_strided_slice %0 {offsets = [0, 4], sizes = [16, 1], strides = [1, 1]} : vector<16x7xf32> to vector<16x1xf32>
    %29 = vector.extract_strided_slice %1 {offsets = [4, 0], sizes = [1, 50], strides = [1, 1]} : vector<7x50xf32> to vector<1x50xf32>
    %30 = vector.broadcast %28 : vector<16x1xf32> to vector<16x50xf32>
    %31 = vector.broadcast %29 : vector<1x50xf32> to vector<16x50xf32>
    %32 = arith.mulf %30, %31 : vector<16x50xf32>
    %33 = arith.addf %27, %32 : vector<16x50xf32>
    %34 = vector.extract_strided_slice %0 {offsets = [0, 5], sizes = [16, 1], strides = [1, 1]} : vector<16x7xf32> to vector<16x1xf32>
    %35 = vector.extract_strided_slice %1 {offsets = [5, 0], sizes = [1, 50], strides = [1, 1]} : vector<7x50xf32> to vector<1x50xf32>
    %36 = vector.broadcast %34 : vector<16x1xf32> to vector<16x50xf32>
    %37 = vector.broadcast %35 : vector<1x50xf32> to vector<16x50xf32>
    %38 = arith.mulf %36, %37 : vector<16x50xf32>
    %39 = arith.addf %33, %38 : vector<16x50xf32>
    %40 = vector.extract_strided_slice %0 {offsets = [0, 6], sizes = [16, 1], strides = [1, 1]} : vector<16x7xf32> to vector<16x1xf32>
    %41 = vector.extract_strided_slice %1 {offsets = [6, 0], sizes = [1, 50], strides = [1, 1]} : vector<7x50xf32> to vector<1x50xf32>
    %42 = vector.broadcast %40 : vector<16x1xf32> to vector<16x50xf32>
    %43 = vector.broadcast %41 : vector<1x50xf32> to vector<16x50xf32>
    %44 = arith.mulf %42, %43 : vector<16x50xf32>
    %45 = arith.addf %39, %44 : vector<16x50xf32>
    %cst = arith.constant 0.000000e+00 : f32
    %46 = vector.broadcast %cst : f32 to vector<16x50xf32>
    %47 = arith.subf %46, %45 : vector<16x50xf32>
    %48 = math.exp %47 : vector<16x50xf32>
    %cst_5 = arith.constant 1.000000e+00 : f32
    %49 = vector.broadcast %cst_5 : f32 to vector<16x50xf32>
    %50 = arith.addf %49, %48 : vector<16x50xf32>
    %51 = tpu.reciprocal %50 {approx = true} : vector<16x50xf32> -> vector<16x50xf32>
    %52 = arith.truncf %51 : vector<16x50xf32> to vector<16x50xbf16>
    %c0_6 = arith.constant 0 : index
    %c0_7 = arith.constant 0 : index
    %53 = vector.load %arg4[%c0_6, %c0_7] : memref<50x50xbf16, #tpu.memory_space<vmem>>, vector<50x50xbf16>
    %cst_8 = arith.constant dense<0.000000e+00> : vector<16x50xf32>
    %54 = tpu.matmul %52, %53, %cst_8 {dimension_numbers = #tpu.dot_dimension_numbers<[1], [0], [0], [1], [0, 0, 1, 1], [], []>} : vector<16x50xbf16>, vector<50x50xbf16>, vector<16x50xf32> -> vector<16x50xf32>
    %c0_9 = arith.constant 0 : index
    %c0_10 = arith.constant 0 : index
    %55 = vector.load %arg5[%c0_9, %c0_10] : memref<1x50xf32, #tpu.memory_space<vmem>>, vector<1x50xf32>
    %56 = vector.broadcast %55 : vector<1x50xf32> to vector<16x50xf32>
    %57 = arith.addf %54, %56 : vector<16x50xf32>
    %cst_11 = arith.constant 0.000000e+00 : f32
    %58 = vector.broadcast %cst_11 : f32 to vector<16x50xf32>
    %59 = arith.subf %58, %57 : vector<16x50xf32>
    %60 = math.exp %59 : vector<16x50xf32>
    %cst_12 = arith.constant 1.000000e+00 : f32
    %61 = vector.broadcast %cst_12 : f32 to vector<16x50xf32>
    %62 = arith.addf %61, %60 : vector<16x50xf32>
    %63 = tpu.reciprocal %62 {approx = true} : vector<16x50xf32> -> vector<16x50xf32>
    %64 = arith.truncf %63 : vector<16x50xf32> to vector<16x50xbf16>
    %c0_13 = arith.constant 0 : index
    %c0_14 = arith.constant 0 : index
    %65 = vector.load %arg6[%c0_13, %c0_14] : memref<50x2xbf16, #tpu.memory_space<vmem>>, vector<50x2xbf16>
    %cst_15 = arith.constant dense<0.000000e+00> : vector<16x2xf32>
    %66 = tpu.matmul %64, %65, %cst_15 {dimension_numbers = #tpu.dot_dimension_numbers<[1], [0], [0], [1], [0, 0, 1, 1], [], []>} : vector<16x50xbf16>, vector<50x2xbf16>, vector<16x2xf32> -> vector<16x2xf32>
    %c0_16 = arith.constant 0 : index
    %c0_17 = arith.constant 0 : index
    %67 = vector.load %arg7[%c0_16, %c0_17] : memref<1x2xf32, #tpu.memory_space<vmem>>, vector<1x2xf32>
    %68 = vector.broadcast %67 : vector<1x2xf32> to vector<16x2xf32>
    %69 = arith.addf %66, %68 : vector<16x2xf32>
    %70 = vector.extract_strided_slice %69 {offsets = [0, 0], sizes = [16, 1], strides = [1, 1]} : vector<16x2xf32> to vector<16x1xf32>
    %71 = vector.extract_strided_slice %69 {offsets = [0, 1], sizes = [16, 1], strides = [1, 1]} : vector<16x2xf32> to vector<16x1xf32>
    %72 = arith.maximumf %70, %71 : vector<16x1xf32>
    %73 = arith.subf %70, %72 : vector<16x1xf32>
    %74 = math.exp %73 : vector<16x1xf32>
    %75 = arith.subf %71, %72 : vector<16x1xf32>
    %76 = math.exp %75 : vector<16x1xf32>
    %77 = arith.addf %74, %76 : vector<16x1xf32>
    %78 = math.log %77 : vector<16x1xf32>
    %79 = arith.addf %72, %78 : vector<16x1xf32>
    %80 = vector.broadcast %79 : vector<16x1xf32> to vector<16x2xf32>
    %81 = arith.subf %69, %80 : vector<16x2xf32>
    %c0_18 = arith.constant 0 : index
    %c0_19 = arith.constant 0 : index
    %82 = vector.load %arg8[%c0_18, %c0_19] : memref<16x2xf32, #tpu.memory_space<vmem>>, vector<16x2xf32>
    tpu.vector_store %arg8[%c0_18, %c0_19], %81 {strides = array<i32>} : memref<16x2xf32, #tpu.memory_space<vmem>>, vector<16x2xf32>,
    return
  }
  func.func @transform_0(%arg0: i32) -> (i32, i32) {
    %c0_i32 = arith.constant 0 : i32
    %c0_i32_0 = arith.constant 0 : i32
    return %arg0, %c0_i32 : i32, i32
  }
  func.func @transform_1(%arg0: i32) -> (i32, i32) {
    %c0_i32 = arith.constant 0 : i32
    %c0_i32_0 = arith.constant 0 : i32
    %c0_i32_1 = arith.constant 0 : i32
    return %c0_i32, %c0_i32_0 : i32, i32
  }
  func.func @transform_2(%arg0: i32) -> (i32, i32) {
    %c0_i32 = arith.constant 0 : i32
    %c0_i32_0 = arith.constant 0 : i32
    %c0_i32_1 = arith.constant 0 : i32
    return %c0_i32, %c0_i32_0 : i32, i32
  }
  func.func @transform_3(%arg0: i32) -> (i32, i32) {
    %c0_i32 = arith.constant 0 : i32
    %c0_i32_0 = arith.constant 0 : i32
    %c0_i32_1 = arith.constant 0 : i32
    return %c0_i32, %c0_i32_0 : i32, i32
  }
  func.func @transform_4(%arg0: i32) -> (i32, i32) {
    %c0_i32 = arith.constant 0 : i32
    %c0_i32_0 = arith.constant 0 : i32
    %c0_i32_1 = arith.constant 0 : i32
    return %c0_i32, %c0_i32_0 : i32, i32
  }
  func.func @transform_5(%arg0: i32) -> (i32, i32) {
    %c0_i32 = arith.constant 0 : i32
    %c0_i32_0 = arith.constant 0 : i32
    %c0_i32_1 = arith.constant 0 : i32
    return %c0_i32, %c0_i32_0 : i32, i32
  }
  func.func @transform_6(%arg0: i32) -> (i32, i32) {
    %c0_i32 = arith.constant 0 : i32
    %c0_i32_0 = arith.constant 0 : i32
    %c0_i32_1 = arith.constant 0 : i32
    return %c0_i32, %c0_i32_0 : i32, i32
  }
  func.func @transform_7(%arg0: i32) -> (i32, i32) {
    %c0_i32 = arith.constant 0 : i32
    %c0_i32_0 = arith.constant 0 : i32
    return %arg0, %c0_i32 : i32, i32
  }
}

</mosaic_0001>

<bundles_post_ra>
// kernel: tpu_custom_call.1
= control target key start
LH: loop header
LB: loop body
LE: loop exit
PB: predicated region body
PF: predicated region fallthrough
CT: control target
= control target key end

     0   :  { %s897_s24 = smov 0   ;;  %s971_s0 = inlined_call_operand.vmem [shape: f32[64,7], index: 0, kind: input, shape index: {}]   ;;  %s972_s1 = inlined_call_operand.vmem [shape: f32[7,50], index: 1, kind: input, shape index: {}]   ;;  %s973_s2 = inlined_call_operand.vmem [shape: f32[1,50], index: 2, kind: input, shape index: {}]   ;;  %s974_s3 = inlined_call_operand.vmem [shape: bf16[50,50], index: 3, kind: input, shape index: {}]   ;;  %s975_s4 = inlined_call_operand.vmem [shape: f32[1,50], index: 4, kind: input, shape index: {}]   ;;  %s976_s5 = inlined_call_operand.vmem [shape: bf16[50,2], index: 5, kind: input, shape index: {}]   ;;  %s977_s6 = inlined_call_operand.vmem [shape: f32[1,2], index: 6, kind: input, shape index: {}]   ;;  %s978_s7 = inlined_call_operand.vmem [shape: f32[64,2], index: 7, kind: output, shape index: {}]  }
   0x1 LB: > { %s712_s25 = sadd.s32 4294967295, %s844_s24   ;;  %p716_p0 = scmp.ge.s32.totalorder %s844_s24, 1  ;;  %s844_s24 = sphi %s897_s24, %s17_s24  }
   0x2   : > { %p238_p1 = scmp.lt.s32.totalorder %s844_s24, 5 }
   0x4   : > { %p239_p2 = pnand %p716_p0, %p238_p1 }
   0x5   : > { %s717_s26 = sshll.u32 (!%p239_p2), %s712_s25, 1  ;;  %s855_s12 = smov (!%p239_p2), 127  }
   0x6   : > { %242 = sbr.rel (%p239_p2) target bundleno = 1158 (0x486), region = 48  ;;  %p271_p3 = scmp.lt.s32.totalorder (!%p239_p2), %s717_s26, 7 }
   0x7   : > { %s856_s13 = smov (!%p239_p2), 1  }
   0xb   : > { %v846_v0 = vmov 1   ;;  %v847_v1 = vmov 0   ;;  %s980_s26 = smov (!%p271_p3, %s717_s26), 7  ;;  %v848_v4 = vmov 2   ;;  %v849_v5 = vmov 3   ;;  %v803_v12 = vld [vmem:[%s974_s3 + $0x10] sm:$0xff]  }
   0xc   : > { %790 = vset.pattern.permute.xlu1 %v846_v0  ;;  %789 = vset.pattern.permute.xlu0 %v847_v1  ;;  %s718_s27 = sshll.u32 %s980_s26, 3  ;;  %v850_v6 = vmov 4   ;;  %v851_v7 = vmov 5   ;;  %v852_v8 = vmov 6   ;;  %vm457_vm0 = vcmask 1040384   ;;  %v804_v13 = vld [vmem:[%s974_s3 + $0x8] sm:$0xff]  }
   0xd   : > { %s274_s30 = scalar_lea.vmem %s971_s0, %s718_s27  ;;  %v802_v9 = vld [vmem:[%s974_s3 + $0x18] ss:$0 sps:$4 sm:$0x11]   ;;  %v853_v10 = vmov 0.0   ;;  %vm854_vm1 = vmmov 0   ;;  %v805_v14 = vld [vmem:[%s974_s3] sm:$0xff]   ;;  %v297_v15 = vlaneseq  ;;  %s280_s16 = scalar_lea.vmem %s978_s7, %s718_s27 }
   0xe   : > { %v283_v2 = vld [vmem:[%s274_s30] sm:$0xff]  ;;  %v284_v3 = vld [vmem:[%s274_s30 + $0x8] sm:$0xff]  ;;  %746 = vmatprep.subr.bf16.mxu0 %v853_v10  ;;  %v459_v11 = vsel %vm457_vm0, %v802_v9, 0  ;;  %758 = vmatprep.subr.bf16.mxu1 %v853_v10  ;;  %vm453_vm2 = vcmask 408576   ;;  %vm653_vm3 = vcmask 15360  }
   0xf   : > { %312 = vperm.xlu1 %790, %v283_v2   ;;  %289 = vperm.xlu0 %789, %v283_v2   ;;  %v298_v18 = vshrl.u32 %v297_v15, 7  ;;  %v285_v22 = vld [vmem:[%s972_s1] sm:$0x7f] }
  0x10   : > { %747 = vmatpush3.bf16.msra.mxu0 %v459_v11  ;;  %754 = vmatprep.mubr.msk.bf16.mxu0 %vm854_vm1, %v853_v10  ;;  %v721_v31 = vld [vmem:[%s973_s2] ss:$0 sm:$0xff] }
  0x11   : > { %748 = vmatprep.subr.bf16.mxu0 %v853_v10  ;;  %766 = vmatprep.mubr.msk.bf16.mxu1 %vm854_vm1, %v853_v10  ;;  %v299_v21 = vsub.s32 0, %v298_v18  ;;  %v321_v26 = vsub.s32 1, %v298_v18  ;;  %v337_v28 = vsub.s32 2, %v298_v18  ;;  %v353_v30 = vsub.s32 3, %v298_v18 }
  0x12   : > { %v369_v37 = vsub.s32 4, %v298_v18  ;;  %v401_v44 = vsub.s32 6, %v298_v18  ;;  %v385_v48 = vsub.s32 5, %v298_v18 }
  0x13   : > { %316 = vperm.xlu1 %790, %v284_v3   ;;  %294 = vperm.xlu0 %789, %v284_v3   ;;  %v300_v24 = vrot.slane %v285_v22, %v299_v21  ;;  %v322_v33 = vrot.slane %v285_v22, %v321_v26  ;;  %v338_v35 = vrot.slane %v285_v22, %v337_v28  ;;  %v808_v26 = vld [vmem:[%s976_s5 + $0x8] sm:$0xff]   ;;  %v722_v28 = vld [vmem:[%s975_s4] ss:$0 sm:$0xff] }
  0x14   : > { %749 = vmatpush3.bf16.msra.mxu0 %v803_v12  ;;  %v354_v39 = vrot.slane %v285_v22, %v353_v30  ;;  %v370_v47 = vrot.slane %v285_v22, %v369_v37  ;;  %v402_v56 = vrot.slane %v285_v22, %v401_v44  ;;  %v386_v59 = vrot.slane %v285_v22, %v385_v48 }
  0x15   : > { %750 = vmatprep.subr.bf16.mxu0 %v853_v10 }
  0x17   : > { %792 = vset.pattern.permute.xlu1 %v848_v4  ;;  %791 = vset.pattern.permute.xlu0 %v848_v4 }
  0x18   : > { %332 = vperm.xlu1 %792, %v284_v3   ;;  %328 = vperm.xlu0 %791, %v283_v2  }
  0x19   : > { %751 = vmatpush3.bf16.msra.mxu0 %v804_v13 }
  0x1a   : > { %752 = vmatprep.subr.bf16.mxu0 %v853_v10 }
  0x1c   : > { %793 = vset.pattern.permute.xlu1 %v849_v5  ;;  %794 = vset.pattern.permute.xlu0 %v849_v5 }
  0x1d   : > { %344 = vperm.xlu1 %793, %v283_v2   ;;  %348 = vperm.xlu0 %794, %v284_v3  }
  0x1e   : > { %753 = vmatpush3.bf16.msra.mxu0 %v805_v14 }
  0x21   : > { %795 = vset.pattern.permute.xlu1 %v850_v6  ;;  %796 = vset.pattern.permute.xlu0 %v851_v7 }
  0x22   : > { %360 = vperm.xlu1 %795, %v283_v2   ;;  %376 = vperm.xlu0 %796, %v283_v2  }
  0x26   : > { %364 = vperm.xlu1 %795, %v284_v3   ;;  %799 = vset.pattern.permute.xlu0 %v852_v8 }
  0x27   : > { %396 = vperm.xlu0 %799, %v284_v3  }
  0x2a   : > { %797 = vset.pattern.permute.xlu1 %v851_v7 }
  0x2b   : > { %380 = vperm.xlu1 %797, %v284_v3   ;;  %800 = vset.pattern.permute.xlu0 %v847_v1 }
  0x2f   : > { %798 = vset.pattern.permute.xlu1 %v852_v8 }
  0x30   : > { %392 = vperm.xlu1 %798, %v283_v2  }
  0x34   : > { %801 = vset.pattern.permute.xlu1 %v847_v1 }
  0x8a   : > { %v313_v16 = vpop.permute.xlu1 %312  ;;  %v290_v17 = vpop.permute.xlu0 %289 }
  0x8b   : > { %v301_v32 = vmul.f32 %v300_v24, %v290_v17  ;;  %v323_v45 = vmul.f32 %v322_v33, %v313_v16 }
  0x8d   : > { %v309_v41 = vadd.f32 %v721_v31, %v301_v32 }
  0x8e   : > { %v317_v19 = vpop.permute.xlu1 %316  ;;  %v295_v20 = vpop.permute.xlu0 %294 }
  0x8f   : > { %v302_v27 = vmul.f32 %v300_v24, %v295_v20  ;;  %v324_v38 = vmul.f32 %v322_v33, %v317_v19  ;;  %v325_v52 = vadd.f32 %v323_v45, %v309_v41  ;;  %v728_v45 = vld [vmem:[%s977_s6] ss:$0 sm:$0xff] }
  0x91   : > { %v310_v34 = vadd.f32 %v721_v31, %v302_v27  ;;  %v809_v27 = vld [vmem:[%s976_s5] sm:$0xff]  }
  0x93   : > { %v333_v23 = vpop.permute.xlu1 %332  ;;  %v329_v25 = vpop.permute.xlu0 %328  ;;  %v326_v42 = vadd.f32 %v324_v38, %v310_v34 }
  0x94   : > { %v340_v43 = vmul.f32 %v338_v35, %v333_v23  ;;  %v339_v46 = vmul.f32 %v338_v35, %v329_v25  ;;  %v806_v23 = vld [vmem:[%s976_s5 + $0x18] ss:$0 sps:$4 sm:$0x11]   ;;  %v807_v25 = vld [vmem:[%s976_s5 + $0x10] sm:$0xff]  }
  0x95   : > { %v552_v24 = vsel %vm457_vm0, %v806_v23, 0 }
  0x96   : > { %v342_v54 = vadd.f32 %v340_v43, %v326_v42  ;;  %v341_v57 = vadd.f32 %v339_v46, %v325_v52  ;;  %759 = vmatpush3.bf16.msra.mxu1 %v552_v24 }
  0x97   : > { %760 = vmatprep.subr.bf16.mxu1 %v853_v10 }
  0x98   : > { %v345_v29 = vpop.permute.xlu1 %344  ;;  %v349_v36 = vpop.permute.xlu0 %348 }
  0x99   : > { %v356_v50 = vmul.f32 %v354_v39, %v349_v36  ;;  %v355_v53 = vmul.f32 %v354_v39, %v345_v29 }
  0x9a   : > { %761 = vmatpush3.bf16.msra.mxu1 %v807_v25 }
  0x9b   : > { %v358_v61 = vadd.f32 %v356_v50, %v342_v54  ;;  %v357_v62 = vadd.f32 %v355_v53, %v341_v57  ;;  %762 = vmatprep.subr.bf16.mxu1 %v853_v10 }
  0x9d   : > { %v361_v40 = vpop.permute.xlu1 %360  ;;  %v377_v49 = vpop.permute.xlu0 %376 }
  0x9e   : > { %v371_v58 = vmul.f32 %v370_v47, %v361_v40  ;;  %v387_v4 = vmul.f32 %v386_v59, %v377_v49  ;;  %763 = vmatpush3.bf16.msra.mxu1 %v808_v26 }
  0x9f   : > { %764 = vmatprep.subr.bf16.mxu1 %v853_v10 }
  0xa0   : > { %v373_v3 = vadd.f32 %v371_v58, %v357_v62 }
  0xa1   : > { %v365_v51 = vpop.permute.xlu1 %364 }
  0xa2   : > { %v372_v55 = vmul.f32 %v370_v47, %v365_v51  ;;  %v397_v60 = vpop.permute.xlu0 %396  ;;  %v389_v8 = vadd.f32 %v387_v4, %v373_v3  ;;  %765 = vmatpush3.bf16.msra.mxu1 %v809_v27 }
  0xa3   : > { %v404_v2 = vmul.f32 %v402_v56, %v397_v60 }
  0xa4   : > { %v374_v0 = vadd.f32 %v372_v55, %v358_v61 }
  0xa6   : > { %v381_v63 = vpop.permute.xlu1 %380 }
  0xa7   : > { %v388_v1 = vmul.f32 %v386_v59, %v381_v63 }
  0xa9   : > { %v390_v5 = vadd.f32 %v388_v1, %v374_v0 }
  0xab   : > { %v406_v6 = vadd.f32 %v404_v2, %v390_v5  ;;  %v393_v7 = vpop.permute.xlu1 %392 }
  0xac   : > { %v403_v9 = vmul.f32 %v402_v56, %v393_v7 }
  0xad   : > { %v408_v11 = vsub.f32 0.0, %v406_v6 }
  0xae   : > { %v405_v12 = vadd.f32 %v403_v9, %v389_v8 }
  0xaf   : > { %v411_v13 = vmul.f32 1.442695, %v408_v11 }
  0xb0   : > { %v407_v14 = vsub.f32 0.0, %v405_v12 }
  0xb1   : > { %810 = vpow2.f32 %v411_v13 }
  0xb2   : > { %v409_v15 = vmul.f32 1.442695, %v407_v14 }
  0xb4   : > { %812 = vpow2.f32 %v409_v15 }
  0xbe   : > { %v811_v16 = vpop.eup %810 }
  0xbf   : > { %v414_v17 = vadd.f32 1.0, %v811_v16 }
  0xc1   : > { %v813_v18 = vpop.eup %812  ;;  %814 = vrcp.f32 %v414_v17 }
  0xc2   : > { %v413_v19 = vadd.f32 1.0, %v813_v18 }
  0xc4   : > { %816 = vrcp.f32 %v413_v19 }
  0xce   : > { %v815_v20 = vpop.eup %814 }
  0xd1   : > { %v817_v21 = vpop.eup %816 }
  0xd2   : > { %v417_v22 = vpack.c.bf16 %v815_v20, %v817_v21 }
  0xd4   : > { %755 = vmatmul.mubr.msk.bf16.vlgmr.msra.gmra.mxu0 %vm453_vm2, %v417_v22 }
 0x194   : > { %v495_v29 = vpop.f32.mrf.mxu0 }
 0x195   : > { %v496_v30 = vadd.f32 %v722_v28, %v495_v29 }
 0x196   : > { %v756_v31 = vpop.f32.mrf.mxu0 }
 0x197   : > { %v502_v32 = vsub.f32 0.0, %v496_v30 }
 0x198   : > { %v498_v33 = vpop.f32.mrf.mxu0 }
 0x199   : > { %v504_v34 = vmul.f32 1.442695, %v502_v32  ;;  %v499_v35 = vadd.f32 %v722_v28, %v498_v33 }
 0x19a   : > { %v757_v36 = vpop.f32.mrf.mxu0 }
 0x19b   : > { %818 = vpow2.f32 %v504_v34  ;;  %v503_v37 = vsub.f32 0.0, %v499_v35 }
 0x19d   : > { %v506_v38 = vmul.f32 1.442695, %v503_v37 }
 0x19f   : > { %820 = vpow2.f32 %v506_v38 }
 0x1a8   : > { %v819_v39 = vpop.eup %818 }
 0x1a9   : > { %v508_v40 = vadd.f32 1.0, %v819_v39 }
 0x1ab   : > { %822 = vrcp.f32 %v508_v40 }
 0x1ac   : > { %v821_v10 = vpop.eup %820 }
 0x1ad   : > { %v509_v41 = vadd.f32 1.0, %v821_v10 }
 0x1af   : > { %824 = vrcp.f32 %v509_v41 }
 0x1b8   : > { %v823_v42 = vpop.eup %822 }
 0x1bc   : > { %v825_v43 = vpop.eup %824 }
 0x1bd   : > { %v512_v44 = vpack.c.bf16 %v825_v43, %v823_v42 }
 0x1bf   : > { %767 = vmatmul.mubr.msk.bf16.vlgmr.msra.gmra.mxu1 %vm453_vm2, %v512_v44 }
 0x27f   : > { %v588_v46 = vpop.f32.mrf.mxu1 }
 0x280   : > { %v589_v47 = vadd.f32 %v728_v45, %v588_v46 }
 0x281   : > { %v768_v48 = vpop.f32.mrf.mxu1 }
 0x282   : > { %597 = vrot.lane.b32.xlu1 %v589_v47, %s855_s12 }
 0x283   : > { %v591_v49 = vpop.f32.mrf.mxu1 }
 0x284   : > { %v592_v50 = vadd.f32 %v728_v45, %v591_v49 }
 0x285   : > { %v769_v51 = vpop.f32.mrf.mxu1 }
 0x286   : > { %599 = vrot.lane.b32.xlu1 %v592_v50, %s855_s12 }
 0x2f4   : > { %v598_v52 = vpop.permute.xlu1 %597 }
 0x2f5   : > { %v603_v53 = vmax.f32 %v589_v47, %v598_v52 }
 0x2f7   : > { %613 = vrot.lane.b32.xlu0 %v603_v53, %s856_s13  ;;  %v605_v0 = vsub.f32 %v589_v47, %v603_v53 }
 0x2f8   : > { %v600_v54 = vpop.permute.xlu1 %599 }
 0x2f9   : > { %v604_v55 = vmax.f32 %v592_v50, %v600_v54  ;;  %v607_v1 = vmul.f32 1.442695, %v605_v0 }
 0x2fb   : > { %615 = vrot.lane.b32.xlu1 %v604_v55, %s856_s13  ;;  %v606_v2 = vsub.f32 %v592_v50, %v604_v55 }
 0x2fd   : > { %v609_v3 = vmul.f32 1.442695, %v606_v2 }
 0x369   : > { %v614_v56 = vpop.permute.xlu0 %613 }
 0x36a   : > { %v619_v57 = vsub.f32 %v589_v47, %v614_v56 }
 0x36c   : > { %v621_v58 = vmul.f32 1.442695, %v619_v57 }
 0x36d   : > { %v616_v59 = vpop.permute.xlu1 %615 }
 0x36e   : > { %826 = vpow2.f32 %v621_v58  ;;  %v620_v60 = vsub.f32 %v592_v50, %v616_v59 }
 0x370   : > { %v623_v61 = vmul.f32 1.442695, %v620_v60 }
 0x372   : > { %828 = vpow2.f32 %v623_v61 }
 0x373   : > { %830 = vpow2.f32 %v607_v1 }
 0x374   : > { %832 = vpow2.f32 %v609_v3 }
 0x37b   : > { %v827_v62 = vpop.eup %826 }
 0x37c   : > { %627 = vrot.lane.b32.xlu0 %v827_v62, %s855_s12 }
 0x37f   : > { %v829_v63 = vpop.eup %828 }
 0x380   : > { %629 = vrot.lane.b32.xlu1 %v829_v63, %s855_s12  ;;  %v831_v4 = vpop.eup %830 }
 0x381   : > { %v833_v7 = vpop.eup %832 }
 0x3ee   : > { %v628_v5 = vpop.permute.xlu0 %627 }
 0x3ef   : > { %v633_v6 = vadd.f32 %v831_v4, %v628_v5 }
 0x3f1   : > { %834 = vlog2.f32 %v633_v6 }
 0x3f2   : > { %v630_v8 = vpop.permute.xlu1 %629 }
 0x3f3   : > { %v634_v9 = vadd.f32 %v833_v7, %v630_v8 }
 0x3f5   : > { %836 = vlog2.f32 %v634_v9 }
 0x3fe   : > { %v835_v11 = vpop.eup %834 }
 0x3ff   : > { %v636_v12 = vmul.f32 0.6931472, %v835_v11 }
 0x401   : > { %v639_v13 = vadd.f32 %v636_v12, %v603_v53 }
 0x402   : > { %v837_v14 = vpop.eup %836 }
 0x403   : > { %v638_v15 = vmul.f32 0.6931472, %v837_v14  ;;  %643 = vperm.xlu0 %800, %v639_v13  }
 0x405   : > { %v640_v16 = vadd.f32 %v638_v15, %v604_v55 }
 0x407   : > { %648 = vperm.xlu1 %801, %v640_v16  }
 0x47e   : > { %v644_v17 = vpop.permute.xlu0 %643 }
 0x47f   : > { %v651_v18 = vsub.f32 %v589_v47, %v644_v17 }
 0x481   : > { %654 = vst.msk [vmem:[%s280_s16] sm:$0xff] %vm653_vm3, %v651_v18 }
 0x482   : > { %v649_v19 = vpop.permute.xlu1 %648 }
 0x483   : > { %v652_v20 = vsub.f32 %v592_v50, %v649_v19 }
 0x485   : > { %655 = vst.msk [vmem:[%s280_s16 + $0x8] sm:$0xff] %vm653_vm3, %v652_v20 }
 0x486 PF: > { %s17_s24 = sadd.s32 1, %s844_s24  }
 0x487   : > { %p14_p4 = scmp.ge.s32.totalorder %s17_s24, 6  }
 0x489   :  { %16 = sbr.rel (!%p14_p4) target bundleno = 1 (0x1), region = 78 }

</bundles_post_ra>
